<compile_context>
chip_gen: v5e
topology: v5e:2x2
jax: 0.10.0
libtpu: 0.0.40
codegen_flags: <defaults>
</compile_context>

<pallas_src>
import jax
import jax.numpy as jnp
from jax import lax
from jax.experimental import pallas as pl
from jax.experimental.pallas import tpu as pltpu

BN_EPS = 1e-5


def _nl_block_kernel(xq_ref, xk_ref, wg_ref, bg_ref, wa_ref, wb_ref,
                     wz_ref, bz_ref, c0_ref, o_ref, y_acc):
    k = pl.program_id(2)

    @pl.when(k == 0)
    def _():
        y_acc[...] = jnp.zeros_like(y_acc)

    xq = xq_ref[0]                                    # (C, tq) f32, query tile
    xk = xk_ref[0]                                    # (C, tk) f32, key tile

    # g (channels-first): (Ci, tk) = Wg @ xk + bg
    g = jnp.dot(wg_ref[...], xk, preferred_element_type=jnp.float32) + bg_ref[...]

    # rank-1 attention terms: a over query positions (lanes), b over key positions
    # (sublanes, produced directly as a column via a transposed-LHS matmul).
    a_row = jnp.dot(wa_ref[...], xq, preferred_element_type=jnp.float32) + c0_ref[0, 0]  # (1, tq)
    b_col = lax.dot_general(xk, wb_ref[...], (((0,), (0,)), ((), ())),
                            preferred_element_type=jnp.float32)                           # (tk, 1)

    # f^T tile:  ft[j, i] = relu(a[i] + b[j] + c0),  shape (tk, tq)
    ft = jnp.maximum(b_col + a_row, 0.0)

    # y^T accumulation (Ci, tq) on the MXU, bf16 inputs / f32 accumulate.
    y_acc[...] += jnp.dot(g.astype(jnp.bfloat16), ft.astype(jnp.bfloat16),
                          preferred_element_type=jnp.float32)

    @pl.when(k == pl.num_programs(2) - 1)
    def _():
        # Normalize by the FULL N (= num key tiles * tile size), not the tile size.
        inv_n = 1.0 / (pl.num_programs(2) * xk.shape[1])
        y = y_acc[...] * inv_n                                                   # (Ci, tq)
        # W_z (with BatchNorm folded in) + residual, channels-first, lane-dense store.
        w_y = jnp.dot(wz_ref[...], y, preferred_element_type=jnp.float32) + bz_ref[...]  # (C, tq)
        o_ref[0] = (w_y + xq).astype(o_ref.dtype)


def nl_block_pallas(x_bcn, params, *, tile=128):
    """x_bcn: (B, C, N) float32 (NCHW with flattened spatial). Returns (B, C, N)."""
    B, C, N = x_bcn.shape
    Ci = params["wg"].shape[0]

    # Tile the spatial axis; fall back to a full-N block if N is not a multiple of 128.
    tq = tile if N % tile == 0 else N
    tk = tile if N % tile == 0 else N
    nq, nk = N // tq, N // tk

    # ---- host-side weight folding (pure reshapes / tiny matmuls) -------------
    # W_f folded into theta/phi:  a = wa_row @ x + c,  b = x^T @ wb_col
    wa_row = (params["wf_t"] @ params["wth"])[None, :].astype(jnp.float32)   # (1, C)
    wb_col = (params["wf_p"] @ params["wph"])[:, None].astype(jnp.float32)   # (C, 1)
    c0 = (params["wf_t"] @ params["bth"] + params["wf_p"] @ params["bph"]
          + params["bf"]).reshape(1, 1).astype(jnp.float32)                  # (1, 1) scalar
    # BatchNorm (inference form) folded into W_z.
    scale = params["gamma"] * lax.rsqrt(params["rvar"] + BN_EPS)             # (C,)
    wz_f = (params["wz"] * scale[:, None]).astype(jnp.float32)               # (C, Ci)
    bz_f = ((params["bz"] - params["rmean"]) * scale
            + params["beta"])[:, None].astype(jnp.float32)                   # (C, 1)
    wg = params["wg"].astype(jnp.float32)                                    # (Ci, C)
    bg = params["bg"][:, None].astype(jnp.float32)                           # (Ci, 1)

    def wspec(shape):
        nd = len(shape)
        return pl.BlockSpec(shape, lambda b, i, k, _nd=nd: (0,) * _nd)

    in_specs = [
        pl.BlockSpec((1, C, tq), lambda b, i, k: (b, 0, i)),   # x, query tile
        pl.BlockSpec((1, C, tk), lambda b, i, k: (b, 0, k)),   # x, key tile
        wspec(wg.shape), wspec(bg.shape),
        wspec(wa_row.shape), wspec(wb_col.shape),
        wspec(wz_f.shape), wspec(bz_f.shape),
        pl.BlockSpec(memory_space=pltpu.MemorySpace.SMEM),     # c0 scalar in SMEM
    ]
    out_spec = pl.BlockSpec((1, C, tq), lambda b, i, k: (b, 0, i))

    return pl.pallas_call(
        _nl_block_kernel,
        out_shape=jax.ShapeDtypeStruct((B, C, N), jnp.float32),
        grid_spec=pltpu.PrefetchScalarGridSpec(
            num_scalar_prefetch=0,
            grid=(B, nq, nk),
            in_specs=in_specs,
            out_specs=out_spec,
            scratch_shapes=[pltpu.VMEM((Ci, tq), jnp.float32)],   # y^T accumulator
        ),
        compiler_params=pltpu.CompilerParams(
            dimension_semantics=("parallel", "parallel", "arbitrary")),
    )(x_bcn, x_bcn, wg, bg, wa_row, wb_col, wz_f, bz_f, c0)


def init_params(key, in_channels, inter_channels):
    """Synthetic parameters mirroring NLBlock.__init__ shapes (conv (O,I,1,1) -> (O,I)).

    NOTE: the PyTorch module initializes BN gamma/beta to 0 (which zeroes the whole
    W_z branch).  We use nonzero gamma/beta/running stats here so the correctness
    check actually exercises the W_z + BatchNorm path.
    """
    C, Ci = in_channels, inter_channels
    ks = jax.random.split(key, 12)
    return {
        "wg":   0.1 * jax.random.normal(ks[0], (Ci, C), jnp.float32),
        "bg":   0.1 * jax.random.normal(ks[1], (Ci,), jnp.float32),
        "wth":  0.1 * jax.random.normal(ks[2], (Ci, C), jnp.float32),
        "bth":  0.1 * jax.random.normal(ks[3], (Ci,), jnp.float32),
        "wph":  0.1 * jax.random.normal(ks[4], (Ci, C), jnp.float32),
        "bph":  0.1 * jax.random.normal(ks[5], (Ci,), jnp.float32),
        # W_f conv (1, 2*Ci, 1, 1) split into theta-half / phi-half.
        "wf_t": 0.1 * jax.random.normal(ks[6], (Ci,), jnp.float32),
        "wf_p": 0.1 * jax.random.normal(ks[7], (Ci,), jnp.float32),
        "bf":   jnp.float32(0.05),
        "wz":   0.1 * jax.random.normal(ks[8], (C, Ci), jnp.float32),
        "bz":   0.1 * jax.random.normal(ks[9], (C,), jnp.float32),
        "gamma": 1.0 + 0.1 * jax.random.normal(ks[10], (C,), jnp.float32),
        "beta":  0.1 * jax.random.normal(ks[11], (C,), jnp.float32),
        "rmean": 0.05 * jax.random.normal(jax.random.fold_in(key, 100), (C,), jnp.float32),
        "rvar":  jnp.abs(0.3 * jax.random.normal(jax.random.fold_in(key, 101), (C,), jnp.float32)) + 0.8,
    }


def nl_block_reference(x_bcn, p):
    """Pure-JAX reference mirroring the PyTorch forward literally
    (materializes the broadcast-concat tensor; BatchNorm in inference form)."""
    B, C, N = x_bcn.shape
    Ci = p["wg"].shape[0]

    def conv1x1(w, b):
        return jnp.einsum('oc,bcn->bon', w, x_bcn) + b[None, :, None]

    g = conv1x1(p["wg"], p["bg"])          # (B, Ci, N)
    th = conv1x1(p["wth"], p["bth"])       # (B, Ci, N)
    ph = conv1x1(p["wph"], p["bph"])       # (B, Ci, N)
    th_b = jnp.broadcast_to(th[:, :, :, None], (B, Ci, N, N))   # theta repeated over j
    ph_b = jnp.broadcast_to(ph[:, :, None, :], (B, Ci, N, N))   # phi repeated over i
    concat = jnp.concatenate([th_b, ph_b], axis=1)              # (B, 2Ci, N, N)
    wf = jnp.concatenate([p["wf_t"], p["wf_p"]], axis=0)        # (2Ci,)
    f = jax.nn.relu(jnp.einsum('c,bcij->bij', wf, concat) + p["bf"])  # (B, N, N)
    g_x = jnp.transpose(g, (0, 2, 1))                           # (B, N, Ci)
    y = jnp.einsum('bij,bjc->bic', f / N, g_x)                  # (B, N, Ci)
    y_cf = jnp.transpose(y, (0, 2, 1))                          # (B, Ci, N)
    wy = jnp.einsum('oc,bcn->bon', p["wz"], y_cf) + p["bz"][None, :, None]
    scale = p["gamma"] / jnp.sqrt(p["rvar"] + BN_EPS)
    wy = (wy - p["rmean"][None, :, None]) * scale[None, :, None] + p["beta"][None, :, None]
    return wy + x_bcn


if __name__ == "__main__":
    B, C, H, W = 2, 4, 16, 16
    Ci = C // 2
    N = H * W

    key = jax.random.PRNGKey(0)
    kx, kp = jax.random.split(key)

    # Module-facing input is NCHW; kernel layout is just the flattened-spatial view.
    x_nchw = jax.random.normal(kx, (B, C, H, W), jnp.float32)
    x_bcn = x_nchw.reshape(B, C, N)        # channels-first, lane-dense N (no transpose)

    params = init_params(kp, C, Ci)

    z_bcn = jax.block_until_ready(nl_block_pallas(x_bcn, params))
    z_nchw = z_bcn.reshape(B, C, H, W)     # module output convention (NCHW)

    ref = nl_block_reference(x_bcn, params)
    max_err = float(jnp.max(jnp.abs(z_bcn - ref)))
    # bf16 MXU inputs (f32 accumulation) for the dominant contraction -> relaxed tol.
    assert jnp.allclose(z_bcn, ref, atol=5e-3, rtol=5e-3), max_err
    assert z_nchw.shape == x_nchw.shape

    print("KERNEL_OK")
</pallas_src>

<mosaic_0001>
module attributes {stable_mosaic.version = 11 : i64} {
  func.func @_nl_block_kernel(%arg0: i32, %arg1: i32, %arg2: i32, %arg3: memref<1x4x128xf32, #tpu.memory_space<vmem>>, %arg4: memref<1x4x128xf32, #tpu.memory_space<vmem>>, %arg5: memref<2x4xf32, #tpu.memory_space<vmem>>, %arg6: memref<2x1xf32, #tpu.memory_space<vmem>>, %arg7: memref<1x4xf32, #tpu.memory_space<vmem>>, %arg8: memref<4x1xf32, #tpu.memory_space<vmem>>, %arg9: memref<4x2xf32, #tpu.memory_space<vmem>>, %arg10: memref<4x1xf32, #tpu.memory_space<vmem>>, %arg11: memref<1x1xf32, #tpu.memory_space<smem>>, %arg12: memref<1x4x128xf32, #tpu.memory_space<vmem>>, %arg13: memref<2x128xf32, #tpu.memory_space<vmem>>) attributes {dimension_semantics = [#tpu.dimension_semantics<parallel>, #tpu.dimension_semantics<parallel>, #tpu.dimension_semantics<arbitrary>], iteration_bounds = array<i64: 2, 2, 2>, scalar_prefetch = 0 : i64, scratch_operands = 1 : i64, tpu.core_type = #tpu.core_type<tc>, window_params = [{transform_indices = @transform_0, window_bounds = array<i64: 1, 4, 128>}, {transform_indices = @transform_1, window_bounds = array<i64: 1, 4, 128>}, {pipeline_mode = #tpu.pipeline_mode<synchronous>, transform_indices = @transform_2, window_bounds = array<i64: 2, 4>}, {pipeline_mode = #tpu.pipeline_mode<synchronous>, transform_indices = @transform_3, window_bounds = array<i64: 2, 1>}, {pipeline_mode = #tpu.pipeline_mode<synchronous>, transform_indices = @transform_4, window_bounds = array<i64: 1, 4>}, {pipeline_mode = #tpu.pipeline_mode<synchronous>, transform_indices = @transform_5, window_bounds = array<i64: 4, 1>}, {pipeline_mode = #tpu.pipeline_mode<synchronous>, transform_indices = @transform_6, window_bounds = array<i64: 4, 2>}, {pipeline_mode = #tpu.pipeline_mode<synchronous>, transform_indices = @transform_7, window_bounds = array<i64: 4, 1>}, {transform_indices = @transform_8, window_bounds = array<i64: 1, 1>}, {transform_indices = @transform_9, window_bounds = array<i64: 1, 4, 128>}]} {
    %c0_i32 = arith.constant 0 : i32
    %0 = arith.cmpi eq, %arg2, %c0_i32 : i32
    %1 = arith.extui %0 : i1 to i32
    %c0_i32_0 = arith.constant 0 : i32
    %2 = arith.cmpi ne, %1, %c0_i32_0 : i32
    scf.if %2 {
      %cst_25 = arith.constant 0.000000e+00 : f32
      %33 = vector.broadcast %cst_25 : f32 to vector<2x128xf32>
      %c0_26 = arith.constant 0 : index
      %c0_27 = arith.constant 0 : index
      %34 = vector.load %arg13[%c0_26, %c0_27] : memref<2x128xf32, #tpu.memory_space<vmem>>, vector<2x128xf32>
      tpu.vector_store %arg13[%c0_26, %c0_27], %33 {strides = array<i32>} : memref<2x128xf32, #tpu.memory_space<vmem>>, vector<2x128xf32>,
    } else {
    }
    %c0 = arith.constant 0 : index
    %c0_1 = arith.constant 0 : index
    %c0_2 = arith.constant 0 : index
    %3 = vector.load %arg3[%c0, %c0_1, %c0_2] : memref<1x4x128xf32, #tpu.memory_space<vmem>>, vector<1x4x128xf32>
    %4 = vector.shape_cast %3 : vector<1x4x128xf32> to vector<4x128xf32>
    %c0_3 = arith.constant 0 : index
    %c0_4 = arith.constant 0 : index
    %c0_5 = arith.constant 0 : index
    %5 = vector.load %arg4[%c0_3, %c0_4, %c0_5] : memref<1x4x128xf32, #tpu.memory_space<vmem>>, vector<1x4x128xf32>
    %6 = vector.shape_cast %5 : vector<1x4x128xf32> to vector<4x128xf32>
    %c0_6 = arith.constant 0 : index
    %c0_7 = arith.constant 0 : index
    %7 = vector.load %arg5[%c0_6, %c0_7] : memref<2x4xf32, #tpu.memory_space<vmem>>, vector<2x4xf32>
    %cst = arith.constant dense<0.000000e+00> : vector<2x128xf32>
    %8 = tpu.matmul %7, %6, %cst {dimension_numbers = #tpu.dot_dimension_numbers<[1], [0], [0], [1], [0, 0, 1, 1], [], []>} : vector<2x4xf32>, vector<4x128xf32>, vector<2x128xf32> -> vector<2x128xf32>
    %c0_8 = arith.constant 0 : index
    %c0_9 = arith.constant 0 : index
    %9 = vector.load %arg6[%c0_8, %c0_9] : memref<2x1xf32, #tpu.memory_space<vmem>>, vector<2x1xf32>
    %10 = vector.broadcast %9 : vector<2x1xf32> to vector<2x128xf32>
    %11 = arith.addf %8, %10 : vector<2x128xf32>
    %c0_10 = arith.constant 0 : index
    %c0_11 = arith.constant 0 : index
    %12 = vector.load %arg7[%c0_10, %c0_11] : memref<1x4xf32, #tpu.memory_space<vmem>>, vector<1x4xf32>
    %cst_12 = arith.constant dense<0.000000e+00> : vector<1x128xf32>
    %13 = tpu.matmul %12, %4, %cst_12 {dimension_numbers = #tpu.dot_dimension_numbers<[1], [0], [0], [1], [0, 0, 1, 1], [], []>} : vector<1x4xf32>, vector<4x128xf32>, vector<1x128xf32> -> vector<1x128xf32>
    %c0_13 = arith.constant 0 : index
    %c0_14 = arith.constant 0 : index
    %14 = memref.load %arg11[%c0_13, %c0_14] : memref<1x1xf32, #tpu.memory_space<smem>>
    %15 = vector.broadcast %14 : f32 to vector<1x128xf32>
    %16 = arith.addf %13, %15 : vector<1x128xf32>
    %c0_15 = arith.constant 0 : index
    %c0_16 = arith.constant 0 : index
    %17 = vector.load %arg8[%c0_15, %c0_16] : memref<4x1xf32, #tpu.memory_space<vmem>>, vector<4x1xf32>
    %cst_17 = arith.constant dense<0.000000e+00> : vector<128x1xf32>
    %18 = tpu.matmul %6, %17, %cst_17 {dimension_numbers = #tpu.dot_dimension_numbers<[0], [0], [1], [1], [0, 1, 1, 1], [], []>} : vector<4x128xf32>, vector<4x1xf32>, vector<128x1xf32> -> vector<128x1xf32>
    %19 = vector.broadcast %18 : vector<128x1xf32> to vector<128x128xf32>
    %20 = vector.broadcast %16 : vector<1x128xf32> to vector<128x128xf32>
    %21 = arith.addf %19, %20 : vector<128x128xf32>
    %cst_18 = arith.constant 0.000000e+00 : f32
    %22 = vector.broadcast %cst_18 : f32 to vector<128x128xf32>
    %23 = arith.maximumf %21, %22 : vector<128x128xf32>
    %c0_19 = arith.constant 0 : index
    %c0_20 = arith.constant 0 : index
    %24 = vector.load %arg13[%c0_19, %c0_20] : memref<2x128xf32, #tpu.memory_space<vmem>>, vector<2x128xf32>
    %25 = arith.truncf %11 : vector<2x128xf32> to vector<2x128xbf16>
    %26 = arith.truncf %23 : vector<128x128xf32> to vector<128x128xbf16>
    %cst_21 = arith.constant dense<0.000000e+00> : vector<2x128xf32>
    %27 = tpu.matmul %25, %26, %cst_21 {dimension_numbers = #tpu.dot_dimension_numbers<[1], [0], [0], [1], [0, 0, 1, 1], [], []>} : vector<2x128xbf16>, vector<128x128xbf16>, vector<2x128xf32> -> vector<2x128xf32>
    %28 = arith.addf %24, %27 : vector<2x128xf32>
    %c0_22 = arith.constant 0 : index
    %c0_23 = arith.constant 0 : index
    %29 = vector.load %arg13[%c0_22, %c0_23] : memref<2x128xf32, #tpu.memory_space<vmem>>, vector<2x128xf32>
    tpu.vector_store %arg13[%c0_22, %c0_23], %28 {strides = array<i32>} : memref<2x128xf32, #tpu.memory_space<vmem>>, vector<2x128xf32>,
    %c1_i32 = arith.constant 1 : i32
    %30 = arith.cmpi eq, %arg2, %c1_i32 : i32
    %31 = arith.extui %30 : i1 to i32
    %c0_i32_24 = arith.constant 0 : i32
    %32 = arith.cmpi ne, %31, %c0_i32_24 : i32
    scf.if %32 {
      %c0_25 = arith.constant 0 : index
      %c0_26 = arith.constant 0 : index
      %33 = vector.load %arg13[%c0_25, %c0_26] : memref<2x128xf32, #tpu.memory_space<vmem>>, vector<2x128xf32>
      %cst_27 = arith.constant 3.906250e-03 : f32
      %34 = vector.broadcast %cst_27 : f32 to vector<2x128xf32>
      %35 = arith.mulf %33, %34 : vector<2x128xf32>
      %c0_28 = arith.constant 0 : index
      %c0_29 = arith.constant 0 : index
      %36 = vector.load %arg9[%c0_28, %c0_29] : memref<4x2xf32, #tpu.memory_space<vmem>>, vector<4x2xf32>
      %cst_30 = arith.constant dense<0.000000e+00> : vector<4x128xf32>
      %37 = tpu.matmul %36, %35, %cst_30 {dimension_numbers = #tpu.dot_dimension_numbers<[1], [0], [0], [1], [0, 0, 1, 1], [], []>} : vector<4x2xf32>, vector<2x128xf32>, vector<4x128xf32> -> vector<4x128xf32>
      %c0_31 = arith.constant 0 : index
      %c0_32 = arith.constant 0 : index
      %38 = vector.load %arg10[%c0_31, %c0_32] : memref<4x1xf32, #tpu.memory_space<vmem>>, vector<4x1xf32>
      %39 = vector.broadcast %38 : vector<4x1xf32> to vector<4x128xf32>
      %40 = arith.addf %37, %39 : vector<4x128xf32>
      %41 = arith.addf %40, %4 : vector<4x128xf32>
      %c0_33 = arith.constant 0 : index
      %c0_34 = arith.constant 0 : index
      %c0_35 = arith.constant 0 : index
      %42 = vector.load %arg12[%c0_33, %c0_34, %c0_35] : memref<1x4x128xf32, #tpu.memory_space<vmem>>, vector<1x4x128xf32>
      %43 = vector.shape_cast %42 : vector<1x4x128xf32> to vector<4x128xf32>
      %44 = vector.shape_cast %41 : vector<4x128xf32> to vector<1x4x128xf32>
      tpu.vector_store %arg12[%c0_33, %c0_34, %c0_35], %44 {strides = array<i32>} : memref<1x4x128xf32, #tpu.memory_space<vmem>>, vector<1x4x128xf32>,
    } else {
    }
    return
  }
  func.func @transform_0(%arg0: i32, %arg1: i32, %arg2: i32) -> (i32, i32, i32) {
    %c0_i32 = arith.constant 0 : i32
    %c0_i32_0 = arith.constant 0 : i32
    return %arg0, %c0_i32, %arg1 : i32, i32, i32
  }
  func.func @transform_1(%arg0: i32, %arg1: i32, %arg2: i32) -> (i32, i32, i32) {
    %c0_i32 = arith.constant 0 : i32
    %c0_i32_0 = arith.constant 0 : i32
    return %arg0, %c0_i32, %arg2 : i32, i32, i32
  }
  func.func @transform_2(%arg0: i32, %arg1: i32, %arg2: i32) -> (i32, i32) {
    %c0_i32 = arith.constant 0 : i32
    %c0_i32_0 = arith.constant 0 : i32
    %c0_i32_1 = arith.constant 0 : i32
    return %c0_i32, %c0_i32_0 : i32, i32
  }
  func.func @transform_3(%arg0: i32, %arg1: i32, %arg2: i32) -> (i32, i32) {
    %c0_i32 = arith.constant 0 : i32
    %c0_i32_0 = arith.constant 0 : i32
    %c0_i32_1 = arith.constant 0 : i32
    return %c0_i32, %c0_i32_0 : i32, i32
  }
  func.func @transform_4(%arg0: i32, %arg1: i32, %arg2: i32) -> (i32, i32) {
    %c0_i32 = arith.constant 0 : i32
    %c0_i32_0 = arith.constant 0 : i32
    %c0_i32_1 = arith.constant 0 : i32
    return %c0_i32, %c0_i32_0 : i32, i32
  }
  func.func @transform_5(%arg0: i32, %arg1: i32, %arg2: i32) -> (i32, i32) {
    %c0_i32 = arith.constant 0 : i32
    %c0_i32_0 = arith.constant 0 : i32
    %c0_i32_1 = arith.constant 0 : i32
    return %c0_i32, %c0_i32_0 : i32, i32
  }
  func.func @transform_6(%arg0: i32, %arg1: i32, %arg2: i32) -> (i32, i32) {
    %c0_i32 = arith.constant 0 : i32
    %c0_i32_0 = arith.constant 0 : i32
    %c0_i32_1 = arith.constant 0 : i32
    return %c0_i32, %c0_i32_0 : i32, i32
  }
  func.func @transform_7(%arg0: i32, %arg1: i32, %arg2: i32) -> (i32, i32) {
    %c0_i32 = arith.constant 0 : i32
    %c0_i32_0 = arith.constant 0 : i32
    %c0_i32_1 = arith.constant 0 : i32
    return %c0_i32, %c0_i32_0 : i32, i32
  }
  func.func @transform_8(%arg0: i32, %arg1: i32, %arg2: i32) -> (i32, i32) {
    %c0_i32 = arith.constant 0 : i32
    %c0_i32_0 = arith.constant 0 : i32
    %c0_i32_1 = arith.constant 0 : i32
    return %c0_i32, %c0_i32_0 : i32, i32
  }
  func.func @transform_9(%arg0: i32, %arg1: i32, %arg2: i32) -> (i32, i32, i32) {
    %c0_i32 = arith.constant 0 : i32
    %c0_i32_0 = arith.constant 0 : i32
    return %arg0, %c0_i32, %arg1 : i32, i32, i32
  }
}

</mosaic_0001>

<bundles_post_ra>
// kernel: tpu_custom_call.1
= control target key start
LH: loop header
LB: loop body
LE: loop exit
PB: predicated region body
PF: predicated region fallthrough
CT: control target
= control target key end

     0   :  { %s1700_s0 = inlined_call_operand.hbm [shape: f32[2,4,256], index: 0, kind: input, shape index: {}]   ;;  %s1701_s1 = inlined_call_operand.hbm [shape: f32[2,4,256], index: 1, kind: input, shape index: {}]   ;;  %s1702_s2 = inlined_call_operand.vmem [shape: f32[2,4], index: 2, kind: input, shape index: {}]   ;;  %s1703_s3 = inlined_call_operand.vmem [shape: f32[2,1], index: 3, kind: input, shape index: {}]   ;;  %s1704_s4 = inlined_call_operand.vmem [shape: f32[1,4], index: 4, kind: input, shape index: {}]   ;;  %s1705_s5 = inlined_call_operand.vmem [shape: f32[4,1], index: 5, kind: input, shape index: {}]   ;;  %s1706_s6 = inlined_call_operand.vmem [shape: f32[4,2], index: 6, kind: input, shape index: {}]   ;;  %s1707_s7 = inlined_call_operand.vmem [shape: f32[4,1], index: 7, kind: input, shape index: {}]   ;;  %s1708_s8 = inlined_call_operand.<no memory space> [shape: f32[1,1], index: 8, kind: input, shape index: {}]   ;;  %s1709_s9 = inlined_call_operand.hbm [shape: f32[2,4,256], index: 9, kind: output, shape index: {}]  }
   0x1   :  { %1720 = sst [smem:[#allocation21_spill]] %s1700_s0 }
   0x2   :  { %1721 = sst [smem:[#allocation22_spill]] %s1703_s3 }
   0x3   :  { %1722 = sst [smem:[#allocation23_spill]] %s1704_s4 }
   0x4   :  { %1723 = sst [smem:[#allocation24_spill]] %s1706_s6 }
   0x5   :  { %1724 = sst [smem:[#allocation25_spill]] %s1707_s7 }
   0x6   :  { %1725 = sst [smem:[#allocation26_spill]] %s1709_s9 }
   0x7   :  { %14 = sst [smem:[#allocation3]] %s1708_s8 }
   0x8   :  { %15 = vsyncpa [#allocation5], 0 }
   0x9   :  { %17 = vsyncpa [#allocation5 + $0x1], 0 }
   0xa   :  { %18 = vsyncpa [#allocation8], 0 }
   0xb   :  { %20 = vsyncpa [#allocation8 + $0x1], 0 }
   0xc   :  { %21 = vsyncpa [#allocation6], 0 }
   0xd   :  { %23 = vsyncpa [#allocation6 + $0x1], 0  ;;  %s1391_s11 = smov 0   ;;  %s1393_s12 = smov 0  }
   0xe   :  { %s1395_s13 = smov 0   ;;  %s1397_s14 = smov 0  }
   0xf   :  { %s1399_s15 = smov 0   ;;  %s1401_s16 = smov 0  }
  0x10   :  { %s1403_s17 = smov 0   ;;  %s1405_s8 = smov 0  }
  0x11   :  { %s1407_s18 = smov 0   ;;  %s1409_s19 = smov 0  }
  0x12   :  { %s1411_s20 = smov 0   ;;  %s1413_s21 = smov 0  }
  0x13   :  { %s1415_s22 = smov 0  }
  0x14 LB: > { %1726 = sst [smem:[#allocation13_spill]] %s1297_s14  ;;  %s954_s23 = sadd.s32 4294967295, %s1333_s22   ;;  %s1333_s22 = sphi %s1415_s22, %s29_s22   ;;  %s1329_s21 = sphi %s1413_s21, %s1774_s21   ;;  %s1325_s20 = sphi %s1411_s20, %s1773_s20   ;;  %s1321_s19 = sphi %s1409_s19, %s1772_s19   ;;  %s1317_s18 = sphi %s1407_s18, %s1771_s18   ;;  %s1313_s8 = sphi %s1405_s8, %s1760_s8   ;;  %s1309_s17 = sphi %s1403_s17, %s1770_s17   ;;  %s1305_s16 = sphi %s1401_s16, %s1769_s16   ;;  %s1301_s15 = sphi %s1399_s15, %s1768_s15   ;;  %s1297_s14 = sphi %s1397_s14, %s1767_s14   ;;  %s1293_s13 = sphi %s1395_s13, %s1766_s13   ;;  %s1289_s12 = sphi %s1393_s12, %s1765_s12   ;;  %s1285_s11 = sphi %s1391_s11, %s1764_s11  }
  0x15   : > { %1727 = sst [smem:[#allocation14_spill]] %s1313_s8  ;;  %s955_s24 = sadd.s32 4294967294, %s1333_s22  }
  0x16   : > { %1728 = sst [smem:[#allocation15_spill]] %s1317_s18  ;;  %p64_p0 = scmp.ne.s32.totalorder %s1305_s16, %s1301_s15 }
  0x17   : > { %1729 = sst [smem:[#allocation16_spill]] %s1325_s20  ;;  %p65_p1 = scmp.eq.s32.totalorder %s1333_s22, 0 }
  0x18   : > { %p70_p2 = scmp.ne.s32.totalorder %s1301_s15, %s1297_s14  ;;  %p1466_p3 = scmp.eq.s32.totalorder %s954_s23, 0 }
  0x19   : > { %p271_p4 = scmp.eq.s32.totalorder %s954_s23, 7  ;;  %p1472_p5 = por %p65_p1, %p64_p0 }
  0x1a   : > { %p277_p6 = scmp.eq.s32.totalorder %s955_s24, 7  ;;  %p1478_p7 = por %p1466_p3, %p70_p2 }
  0x1b   : > { %p1482_p8 = por %p271_p4, %p64_p0  ;;  %p1017_p10 = scmp.lt.s32.totalorder %s1333_s22, 8 }
  0x1c   : > { %p1486_p9 = por %p277_p6, %p70_p2  ;;  %s318_s27 = sand.u32 1, %s1305_s16  }
  0x1d   : > { %s1733_s10 = scalar_select %p1482_p8, 1, 0 }
  0x1e   : > { %s1735_s23 = scalar_select %p1486_p9, 1, 0 }
  0x1f   : > { %1734 = sst [smem:[#allocation17_spill]] %s1733_s10  ;;  %s958_s26 = sshll.u32 %s318_s27, 2 }
  0x20   : > { %1736 = sst [smem:[#allocation18_spill]] %s1735_s23  ;;  %s1715_s24 = sshll.u32 %s1329_s21, 1 }
  0x21   : > { %s326_s25 = sadd.s32 %s1325_s20, %s1715_s24  ;;  %s322_s14 = scalar_lea.vmem [#allocation4], %s958_s26 }
  0x22   : > { %s332_s9 = sshll.u32 %s322_s14, 4  ;;  %s960_s10 = sshll.u32 %s326_s25, 2  ;;  %s333_s9 = int_to_ptr.vmem [resolvable:$true] %s332_s9 }
  0x23   : > { %s1737_s0 = sld [smem:[#allocation21_spill]]  ;;  %p1007_p11 = pnand %p1017_p10, %p1472_p5 }
  0x24   : > { %p964_p12 = scmp.ge.s32.totalorder %s1333_s22, 1  ;;  %s319_s14 = scalar_lea.sflag [#allocation5], %s318_s27 }
  0x25   : > { %p358_p13 = scmp.lt.s32.totalorder %s1333_s22, 9  ;;  %s41_s25 = sadd.s32 1, %s1321_s19 }
  0x26   : > { %p42_p2 = scmp.ge.s32.totalorder %s41_s25, 2  ;;  %p92_p4 = scmp.ne.s32.totalorder %s1293_s13, %s1289_s12 }
  0x27   : > { %p1505_p0 = pnand %p964_p12, %p358_p13  ;;  %p98_p5 = scmp.ne.s32.totalorder %s1289_s12, %s1285_s11 }
  0x28   : > { %s1776_s25 = smov (%p42_p2, %s41_s25), 0  ;;  %s1740_s27 = sadd.s32 1, %s1325_s20 }
  0x29   : > { %s328_s18 = scalar_lea.hbm %s1737_s0, %s960_s10  ;;  %1739 = sst [smem:[#allocation19_spill]] %s1776_s25 }
  0x2a   : > { %s330_s24 = sshll.u32 %s328_s18, 4  ;;  %s1717_s18 = sand.u32 1, %s1293_s13   ;;  %s331_s24 = int_to_ptr.hbm [resolvable:$true] %s330_s24 }
  0x2b   : > { %1009 = dma.hbm_to_vmem [thread:$0]  (!%p1007_p11), %s331_s24, 64, %s333_s9, %s319_s14  }
  0x2c   : > { %s1778_s27 = smov (!%p42_p2, %s1740_s27), %s1325_s20  ;;  %s81_s9 = ssub.s32 %s1321_s19, %s1776_s25 }
  0x2d   : > { %p1525_p6 = por %p92_p4, %p65_p1  ;;  %p46_p11 = scmp.ge.s32.totalorder %s1778_s27, 2 }
  0x2e   : > { %p1531_p12 = por %p98_p5, %p1466_p3  ;;  %s961_s11 = sshll.u32 %s1717_s18, 2 }
  0x2f   : > { %s1780_s27 = smov (%p46_p11, %s1778_s27), 0  ;;  %s1744_s23 = sadd.s32 1, %s1329_s21 }
  0x30   : > { %1743 = sst [smem:[#allocation20_spill]] %s1780_s27  ;;  %s1782_s23 = smov (!%p46_p11, %s1744_s23), %s1329_s21 }
  0x31   : > { %s53_s24 = ssub.s32 %s1325_s20, %s1780_s27  ;;  %p50_p1 = scmp.ge.s32.totalorder %s1782_s23, 2 }
  0x32   : > { %s1745_s14 = sshll.u32 %s1329_s21, 1  ;;  %s343_s0 = scalar_lea.vmem [#allocation7], %s961_s11 }
  0x33   : > { %s347_s26 = sadd.s32 %s1321_s19, %s1745_s14  ;;  %s353_s25 = sshll.u32 %s343_s0, 4  ;;  %s354_s25 = int_to_ptr.vmem [resolvable:$true] %s353_s25 }
  0x34   : > { %s963_s28 = sshll.u32 %s347_s26, 2  ;;  %s1784_s23 = smov (%p50_p1, %s1782_s23), 0 }
  0x35   : > { %s349_s27 = scalar_lea.hbm %s1701_s1, %s963_s28  ;;  %s52_s20 = ssub.s32 %s1329_s21, %s1784_s23 }
  0x36   : > { %s351_s6 = sshll.u32 %s349_s27, 4  ;;  %s54_s3 = sor.u32 %s53_s24, %s52_s20  ;;  %s352_s6 = int_to_ptr.hbm [resolvable:$true] %s351_s6 }
  0x37   : > { %s82_s4 = sor.u32 %s81_s9, %s52_s20  ;;  %p55_p3 = scmp.eq.s32.totalorder %s54_s3, 0 }
  0x38   : > { %p83_p13 = scmp.eq.s32.totalorder %s82_s4, 0  ;;  %p1010_p2 = pnand %p1017_p10, %p1525_p6 }
  0x39   : > { %s1746_s26 = sadd.s32 1, %s1305_s16  ;;  %s1747_s11 = sadd.s32 1, %s1293_s13 }
  0x3a   : > { %s1561_s0 = scalar_select %p55_p3, %s1305_s16, %s1746_s26  }
  0x3b   : > { %s1566_s14 = scalar_select %p83_p13, %s1293_s13, %s1747_s11  }
  0x3c   : > { %s1748_s7 = sand.u32 1, %s1293_s13   ;;  %362 = sbr.rel (%p1505_p0) target bundleno = 953 (0x3b9), region = 56 }
  0x3d   : > { %s340_s18 = scalar_lea.sflag [#allocation8], %s1748_s7  ;;  %s1573_s3 = sand.u32 (!%p1505_p0), 1, %s1301_s15  }
  0x3e   : > { %1012 = dma.hbm_to_vmem [thread:$0]  (!%p1010_p2), %s352_s6, 64, %s354_s25, %s340_s18  }
  0x3f   : > { %s965_s4 = sshll.u32 (!%p1505_p0), %s1573_s3, 2  ;;  %s365_s20 = scalar_lea.sflag (!%p1505_p0), [#allocation5], %s1573_s3 }
  0x40   : > { %s368_s27 = scalar_lea.vmem (!%p1505_p0), [#allocation4], %s965_s4 }
  0x41   : > { %1272 = dma.done.wait (%p1478_p7), %s365_s20, 64  }
  0x42   : > { %1274 = vsyncadd (%p1478_p7), %s365_s20, 4294967232  ;;  %s374_s6 = sand.u32 1, %s1289_s12  }
  0x43   : > { %s966_s25 = sshll.u32 %s374_s6, 2  ;;  %s375_s8 = scalar_lea.sflag [#allocation8], %s374_s6 }
  0x44   : > { %s378_s9 = scalar_lea.vmem [#allocation7], %s966_s25 }
  0x45   : > { %1276 = dma.done.wait (%p1531_p12), %s375_s8, 64  }
  0x46   : > { %1278 = vsyncadd (%p1531_p12), %s375_s8, 4294967232  ;;  %s1586_s29 = scalar_lea.vmem [#allocation9], %s965_s4  ;;  %p968_p10 = scmp.ne.s32.totalorder %s1309_s17, 0 }
  0x48   : > { %422 = sbr.rel (%p968_p10) target bundleno = 79 (0x4f), region = 68 }
  0x4d   : > { %v1335_v0 = vmov 0.0  }
  0x4e   : > { %423 = vst [vmem:[#allocation2] sm:$0x3] %v1335_v0 }
  0x4f PF: > { %v425_v1 = vld [vmem:[%s378_s9] sm:$0xf]  ;;  %vm437_vm0 = vcmask 1043456   ;;  %v426_v2 = vld [vmem:[%s1702_s2] sm:$0x3]  ;;  %vm433_vm1 = vcmask 31744  }
  0x50   : > { %491 = vxpose.xlu0.b32.start.end [1/1] (short) %v425_v1, 128  ;;  %969 = vmatpush.msk.msra.mxu0 %vm437_vm0, %v425_v1  ;;  %v490_v3 = vld [vmem:[%s1705_s5] sm:$0xf]  ;;  %s1749_s7 = sld [smem:[#allocation23_spill]]  ;;  %v1336_v22 = vmov 0   ;;  %p990_p7 = scmp.ne.s32.totalorder %s1309_s17, 1 }
  0x51   : > { %970 = vmatmul.msk.f32.vlgmr.msra.gmra.mxu0 %vm433_vm1, %v426_v2  ;;  %999 = vmatpush.msk.msra.mxu2 %vm437_vm0, %v490_v3  ;;  %v1596_v4 = vld [vmem:[%s368_s27] sm:$0xf]  ;;  %s1750_s20 = sld [smem:[#allocation22_spill]] }
  0x52   : > { %973 = vmatpush.msk.msrb.mxu0 %vm437_vm0, %v490_v3  ;;  %971 = vmatpush.msk.msra.mxu1 %vm437_vm0, %v1596_v4  ;;  %s462_s27 = sld [smem:[#allocation3]] }
  0x53   : > { %1128 = vset.pattern.permute.xlu1 %v1336_v22  ;;  %1129 = vset.pattern.permute.xlu2 %v1336_v22  ;;  %s1751_s8 = sld [smem:[#allocation24_spill]] (!%p990_p7) }
  0x54   : > { %998 = vmatpush.msk.msrb.mxu1 %vm437_vm0, %v490_v3  ;;  %s1752_s24 = sld [smem:[#allocation25_spill]] (!%p990_p7) }
  0x56   : > { %v461_v6 = vld [vmem:[%s1749_s7] sm:$0x1] }
  0x57   : > { %972 = vmatmul.msk.f32.vlgmr.msra.gmra.mxu1 %vm433_vm1, %v461_v6  ;;  %v427_v41 = vld [vmem:[%s1750_s20] sm:$0x3] }
  0x58   : > { %v463_v47 = vstv %s462_s27 }
  0xb7   : > { %1127 = vset.pattern.permute.xlu0 %v1336_v22 }
  0xce   : > { %v1619_v27 = vpop.f32.mrf.mxu0 }
  0xd4   : > { %v487_v23 = vpop.f32.mrf.mxu1 }
  0xd5   : > { %v488_v49 = vadd.f32 %v487_v23, %v463_v47 }
  0xd7   : > { %v719_v52 = vperm.slane %v488_v49, 0 }
  0xf4   : > { %v507_v5 = vpop.trf.xlu0 }
  0xf5   : > { %974 = vmatmul.msk.f32.vlgmr.msrb.gmra.mxu0 %vm433_vm1, %v507_v5 }
  0xfc   : > { %v508_v7 = vpop.trf.xlu0 }
  0xfd   : > { %975 = vmatmul.msk.f32.gmra.mxu0 %vm433_vm1, %v508_v7 }
 0x104   : > { %v509_v8 = vpop.trf.xlu0 }
 0x105   : > { %976 = vmatmul.msk.f32.gmra.mxu0 %vm433_vm1, %v509_v8 }
 0x10c   : > { %v510_v9 = vpop.trf.xlu0 }
 0x10d   : > { %977 = vmatmul.msk.f32.gmra.mxu0 %vm433_vm1, %v510_v9 }
 0x114   : > { %v511_v10 = vpop.trf.xlu0 }
 0x115   : > { %978 = vmatmul.msk.f32.gmra.mxu0 %vm433_vm1, %v511_v10 }
 0x11c   : > { %v512_v11 = vpop.trf.xlu0 }
 0x11d   : > { %979 = vmatmul.msk.f32.vlgmr.msrb.gmra.mxu1 %vm433_vm1, %v512_v11 }
 0x124   : > { %v513_v12 = vpop.trf.xlu0 }
 0x125   : > { %980 = vmatmul.msk.f32.gmra.mxu1 %vm433_vm1, %v513_v12 }
 0x12c   : > { %v514_v13 = vpop.trf.xlu0 }
 0x12d   : > { %981 = vmatmul.msk.f32.gmra.mxu1 %vm433_vm1, %v514_v13 }
 0x134   : > { %v515_v14 = vpop.trf.xlu0 }
 0x135   : > { %982 = vmatmul.msk.f32.gmra.mxu1 %vm433_vm1, %v515_v14 }
 0x13c   : > { %v516_v15 = vpop.trf.xlu0 }
 0x13d   : > { %983 = vmatmul.msk.f32.gmra.mxu1 %vm433_vm1, %v516_v15 }
 0x144   : > { %v517_v16 = vpop.trf.xlu0 }
 0x145   : > { %984 = vmatmul.msk.f32.vlgmr.msra.gmra.mxu2 %vm433_vm1, %v517_v16 }
 0x14c   : > { %v518_v17 = vpop.trf.xlu0 }
 0x14d   : > { %985 = vmatmul.msk.f32.gmra.mxu2 %vm433_vm1, %v518_v17 }
 0x154   : > { %v519_v18 = vpop.trf.xlu0 }
 0x155   : > { %986 = vmatmul.msk.f32.gmra.mxu2 %vm433_vm1, %v519_v18 }
 0x15c   : > { %v520_v19 = vpop.trf.xlu0 }
 0x15d   : > { %987 = vmatmul.msk.f32.gmra.mxu2 %vm433_vm1, %v520_v19 }
 0x164   : > { %v521_v20 = vpop.trf.xlu0 }
 0x165   : > { %988 = vmatmul.msk.f32.gmra.mxu2 %vm433_vm1, %v521_v20 }
 0x16c   : > { %v522_v21 = vpop.trf.xlu0 }
 0x16d   : > { %989 = vmatmul.msk.f32.gmra.mxu2 %vm433_vm1, %v522_v21 }
 0x172   : > { %v591_v30 = vpop.f32.mrf.mxu0 }
 0x17a   : > { %v594_v34 = vpop.f32.mrf.mxu0 }
 0x182   : > { %v597_v37 = vpop.f32.mrf.mxu0 }
 0x18a   : > { %v600_v39 = vpop.f32.mrf.mxu0 }
 0x192   : > { %v603_v40 = vpop.f32.mrf.mxu0 }
 0x19a   : > { %v606_v24 = vpop.f32.mrf.mxu1 }
 0x1a2   : > { %v609_v26 = vpop.f32.mrf.mxu1 }
 0x1aa   : > { %v612_v29 = vpop.f32.mrf.mxu1 }
 0x1b2   : > { %v615_v32 = vpop.f32.mrf.mxu1 }
 0x1ba   : > { %v618_v36 = vpop.f32.mrf.mxu1 }
 0x1c8   : > { %v621_v25 = vpop.f32.mrf.mxu2 }
 0x1d0   : > { %v624_v28 = vpop.f32.mrf.mxu2 }
 0x1d8   : > { %v627_v31 = vpop.f32.mrf.mxu2 }
 0x1d9   : > { %701 = vperm.xlu1 %1128, %v627_v31  }
 0x1e0   : > { %v630_v33 = vpop.f32.mrf.mxu2 }
 0x1e1   : > { %696 = vperm.xlu1 %1128, %v624_v28   ;;  %706 = vperm.xlu2 %1129, %v630_v33  }
 0x1e8   : > { %v633_v35 = vpop.f32.mrf.mxu2 }
 0x1e9   : > { %691 = vperm.xlu2 %1129, %v621_v25   ;;  %711 = vperm.xlu0 %1127, %v633_v35  }
 0x1ea   : > { %686 = vperm.xlu1 %1128, %v618_v36  }
 0x1f0   : > { %v636_v38 = vpop.f32.mrf.mxu2 }
 0x1f1   : > { %681 = vperm.xlu2 %1129, %v615_v32  }
 0x1f2   : > { %716 = vperm.xlu1 %1128, %v636_v38  }
 0x1f9   : > { %671 = vperm.xlu2 %1129, %v609_v26  }
 0x1fa   : > { %676 = vperm.xlu1 %1128, %v612_v29  }
 0x201   : > { %661 = vperm.xlu2 %1129, %v603_v40  }
 0x202   : > { %666 = vperm.xlu1 %1128, %v606_v24  }
 0x209   : > { %651 = vperm.xlu2 %1129, %v597_v37  }
 0x20a   : > { %656 = vperm.xlu1 %1128, %v600_v39  }
 0x211   : > { %641 = vperm.xlu2 %1129, %v591_v30  }
 0x212   : > { %646 = vperm.xlu1 %1128, %v594_v34  }
 0x219   : > { %430 = vperm.xlu2 %1129, %v427_v41  }
 0x23b   : > { %v707_v42 = vpop.permute.xlu2 %706 }
 0x23c   : > { %v733_v57 = vadd.f32 %v719_v52, %v707_v42  ;;  %v752_v42 = vld [vmem:[#allocation2] sm:$0x3] }
 0x23e   : > { %v749_v0 = vmax.f32 %v733_v57, 0.0 }
 0x243   : > { %v692_v43 = vpop.permute.xlu2 %691 }
 0x244   : > { %v730_v1 = vadd.f32 %v719_v52, %v692_v43 }
 0x246   : > { %v746_v7 = vmax.f32 %v730_v1, 0.0 }
 0x24b   : > { %v702_v44 = vpop.permute.xlu1 %701  ;;  %v682_v45 = vpop.permute.xlu2 %681 }
 0x24c   : > { %v732_v55 = vadd.f32 %v719_v52, %v702_v44  ;;  %v728_v8 = vadd.f32 %v719_v52, %v682_v45 }
 0x24e   : > { %v748_v61 = vmax.f32 %v732_v55, 0.0  ;;  %v744_v13 = vmax.f32 %v728_v8, 0.0 }
 0x250   : > { %v760_v6 = vpack.c.bf16 %v749_v0, %v748_v61 }
 0x253   : > { %v697_v46 = vpop.permute.xlu1 %696  ;;  %v672_v50 = vpop.permute.xlu2 %671 }
 0x254   : > { %v731_v62 = vadd.f32 %v719_v52, %v697_v46  ;;  %v726_v14 = vadd.f32 %v719_v52, %v672_v50 }
 0x256   : > { %v747_v3 = vmax.f32 %v731_v62, 0.0  ;;  %v742_v19 = vmax.f32 %v726_v14, 0.0 }
 0x258   : > { %v759_v12 = vpack.c.bf16 %v747_v3, %v746_v7 }
 0x25b   : > { %v712_v51 = vpop.permute.xlu0 %711  ;;  %v662_v59 = vpop.permute.xlu2 %661 }
 0x25c   : > { %v687_v48 = vpop.permute.xlu1 %686  ;;  %v734_v53 = vadd.f32 %v719_v52, %v712_v51  ;;  %v724_v20 = vadd.f32 %v719_v52, %v662_v59 }
 0x25d   : > { %v729_v5 = vadd.f32 %v719_v52, %v687_v48 }
 0x25e   : > { %v750_v58 = vmax.f32 %v734_v53, 0.0  ;;  %v740_v23 = vmax.f32 %v724_v20, 0.0 }
 0x25f   : > { %v745_v9 = vmax.f32 %v729_v5, 0.0 }
 0x261   : > { %v758_v18 = vpack.c.bf16 %v745_v9, %v744_v13 }
 0x263   : > { %v652_v10 = vpop.permute.xlu2 %651 }
 0x264   : > { %v717_v54 = vpop.permute.xlu1 %716  ;;  %v722_v24 = vadd.f32 %v719_v52, %v652_v10 }
 0x265   : > { %v735_v56 = vadd.f32 %v719_v52, %v717_v54 }
 0x266   : > { %v738_v30 = vmax.f32 %v722_v24, 0.0 }
 0x267   : > { %v751_v60 = vmax.f32 %v735_v56, 0.0 }
 0x269   : > { %v761_v63 = vpack.c.bf16 %v751_v60, %v750_v58 }
 0x26b   : > { %762 = vmatpush.bf16.msra.mxu3 %v761_v63  ;;  %v642_v25 = vpop.permute.xlu2 %641 }
 0x26c   : > { %v677_v2 = vpop.permute.xlu1 %676  ;;  %v720_v33 = vadd.f32 %v719_v52, %v642_v25 }
 0x26d   : > { %v727_v11 = vadd.f32 %v719_v52, %v677_v2 }
 0x26e   : > { %v736_v37 = vmax.f32 %v720_v33, 0.0 }
 0x26f   : > { %763 = vmatpush.bf16.msra.mxu3 %v760_v6  ;;  %v743_v16 = vmax.f32 %v727_v11, 0.0 }
 0x271   : > { %v757_v22 = vpack.c.bf16 %v743_v16, %v742_v19 }
 0x273   : > { %764 = vmatpush.bf16.msra.mxu3 %v759_v12  ;;  %v431_v35 = vpop.permute.xlu2 %430 }
 0x274   : > { %v667_v15 = vpop.permute.xlu1 %666  ;;  %v459_v39 = vadd.f32 %v1619_v27, %v431_v35 }
 0x275   : > { %v725_v17 = vadd.f32 %v719_v52, %v667_v15 }
 0x276   : > { %v753_v41 = vpack.c.bf16 %v459_v39, %v459_v39 }
 0x277   : > { %765 = vmatpush.bf16.msra.mxu3 %v758_v18  ;;  %v741_v21 = vmax.f32 %v725_v17, 0.0 }
 0x279   : > { %v756_v29 = vpack.c.bf16 %v741_v21, %v740_v23 }
 0x27b   : > { %766 = vmatpush.bf16.msra.mxu3 %v757_v22 }
 0x27c   : > { %v657_v26 = vpop.permute.xlu1 %656 }
 0x27d   : > { %v723_v28 = vadd.f32 %v719_v52, %v657_v26 }
 0x27f   : > { %v739_v31 = vmax.f32 %v723_v28, 0.0  ;;  %767 = vmatpush.bf16.msra.mxu3 %v756_v29 }
 0x281   : > { %v755_v32 = vpack.c.bf16 %v739_v31, %v738_v30 }
 0x283   : > { %768 = vmatpush.bf16.msra.mxu3 %v755_v32 }
 0x284   : > { %v647_v34 = vpop.permute.xlu1 %646 }
 0x285   : > { %v721_v36 = vadd.f32 %v719_v52, %v647_v34 }
 0x287   : > { %v737_v38 = vmax.f32 %v721_v36, 0.0 }
 0x289   : > { %v754_v40 = vpack.c.bf16 %v737_v38, %v736_v37 }
 0x28b   : > { %769 = vmatpush.bf16.msra.mxu3 %v754_v40 }
 0x28e   : > { %770 = vmatmul.bf16.vlgmr.msra.gmra.mxu3 %v753_v41 }
 0x311   : > { %v771_v43 = vpop.f32.mrf.mxu3 }
 0x312   : > { %v775_v44 = vadd.f32 %v771_v43, %v752_v42 }
 0x314   : > { %776 = vst [vmem:[#allocation2] sm:$0x3] %v775_v44 }
 0x315   : > { %780 = sbr.rel (%p990_p7) target bundleno = 930 (0x3a2), region = 72 }
 0x319   : > { %v773_v45 = vpop.f32.mrf.mxu3 }
 0x31a   : > { %vm794_vm2 = vcmask 1041408   ;;  %v783_v47 = vld [vmem:[%s1751_s8] sm:$0xf]  ;;  %vm790_vm3 = vcmask 15360   ;;  %v1337_v49 = vmov 0  }
 0x31b   : > { %v781_v46 = vld [vmem:[#allocation2] sm:$0x3]  ;;  %1130 = vset.pattern.permute.xlu0 %v1337_v49 }
 0x31c   : > { %v782_v27 = vmul.f32 0.00390625, %v781_v46  ;;  %v784_v48 = vld [vmem:[%s1752_s24] sm:$0xf] }
 0x31d   : > { %787 = vperm.xlu0 %1130, %v784_v48  }
 0x31e   : > { %991 = vmatpush.msk.msra.mxu0 %vm794_vm2, %v782_v27 }
 0x31f   : > { %992 = vmatmul.msk.f32.vlgmr.msra.gmra.mxu0 %vm790_vm3, %v783_v47 }
 0x38f   : > { %v788_v50 = vpop.permute.xlu0 %787 }
 0x39c   : > { %v815_v51 = vpop.f32.mrf.mxu0 }
 0x39d   : > { %v816_v52 = vadd.f32 %v815_v51, %v788_v50 }
 0x39f   : > { %v818_v53 = vadd.f32 %v816_v52, %v1596_v4 }
 0x3a1   : > { %819 = vst [vmem:[%s1586_s29] sm:$0xf] %v818_v53 }
 0x3a2 PF: > { %s1753_s17 = sld [smem:[#allocation15_spill]]  ;;  %s835_s7 = sshll.u32 %s1586_s29, 4  ;;  %s836_s7 = int_to_ptr.vmem [resolvable:$true] %s835_s7 }
 0x3a3   : > { %s1754_s10 = sld [smem:[#allocation14_spill]]  ;;  %s821_s8 = scalar_lea.sflag [#allocation6], %s1573_s3 }
 0x3a4   : > { %s1756_s27 = sld [smem:[#allocation26_spill]] }
 0x3a8   : > { %s994_s26 = sshll.u32 %s1753_s17, 1 }
 0x3a9   : > { %s831_s11 = sadd.s32 %s1754_s10, %s994_s26 }
 0x3aa   : > { %s995_s18 = sshll.u32 %s831_s11, 2  ;;  %s1211_s29 = scalar_lea.hbm %s1756_s27, 16 }
 0x3ab   : > { %s833_s6 = scalar_lea.hbm %s1756_s27, %s995_s18 }
 0x3ac   : > { %s837_s25 = sshll.u32 %s833_s6, 4  ;;  %s838_s25 = int_to_ptr.hbm [resolvable:$true] %s837_s25 }
 0x3ad   : > { %s1205_s9 = sshra.s32 %s838_s25, 4  ;;  %s1206_s9 = int_to_ptr.hbm [resolvable:$true] %s1205_s9 }
 0x3ae   : > { %s1207_s30 = scalar_lea.hbm %s1206_s9, 4  ;;  %p1212_p6 = scmp.lt.s32.totalorder %s1206_s9, %s1756_s27 }
 0x3af   : > { %p1208_p0 = scmp.ne.s32.totalorder %s1206_s9, %s1207_s30  ;;  %p1213_p11 = scmp.lt.s32.totalorder %s1211_s29, %s1207_s30 }
 0x3b1   : > { %p1209_p4 = pnand %p1208_p0, %p1482_p8  ;;  %p1214_p12 = por %p1213_p11, %p1212_p6 }
 0x3b3   : > { %p1210_p5 = pneg %p1209_p4 }
 0x3b5   : > { %p1215_p1 = pnand %p1214_p12, %p1210_p5 }
 0x3b7   : > { %1218 = shalt.err (!%p1215_p1)
}
 0x3b8   : > { %1004 = dma.vmem_to_hbm [thread:$0]  (%p1482_p8), %s836_s7, 64, %s838_s25, %s821_s8  }
 0x3b9 PF: > { %s1757_s3 = sld [smem:[#allocation13_spill]]  ;;  %p1018_p3 = scmp.ge.s32.totalorder %s1333_s22, 2 }
 0x3bb   : > { %p1014_p13 = pnand %p1018_p3, %p1486_p9 }
 0x3bd   : > { %p1015_p2 = pneg %p1014_p13 }
 0x3bf   : > { %s849_s18 = sand.u32 1, %s1757_s3  }
 0x3c0   : > { %s850_s4 = scalar_lea.sflag [#allocation6], %s849_s18 }
 0x3c1   : > { %1280 = dma.done.wait (%p1015_p2), %s850_s4, 64  }
 0x3c2   : > { %1282 = vsyncadd (%p1015_p2), %s850_s4, 4294967232  ;;  %s29_s22 = sadd.s32 1, %s1333_s22   ;;  %s1760_s8 = sld [smem:[#allocation16_spill]] }
 0x3c3   : > { %p1656_p10 = scmp.ge.s32.totalorder %s29_s22, 10   ;;  %s1761_s28 = sld [smem:[#allocation19_spill]] }
 0x3c4   : > { %s1762_s7 = sld [smem:[#allocation20_spill]]  ;;  %s1764_s11 = smov %s1289_s12 }
 0x3c5   : > { %s1765_s12 = smov %s1293_s13  ;;  %s1766_s13 = smov %s1566_s14 }
 0x3c6   : > { %s1767_s14 = smov %s1301_s15  ;;  %s1768_s15 = smov %s1305_s16 }
 0x3c7   : > { %s1769_s16 = smov %s1561_s0  ;;  %s1770_s17 = smov %s1321_s19 }
 0x3c8   : > { %s1771_s18 = smov %s1329_s21  ;;  %s1774_s21 = smov %s1784_s23 }
 0x3c9   : > { %s1772_s19 = smov %s1761_s28  ;;  %28 = sbr.rel (!%p1656_p10) target bundleno = 20 (0x14), region = 122 }
 0x3ca   : > { %s1773_s20 = smov %s1762_s7 }
 0x3ce   :  { %856 = vsyncpa [#allocation5], 1 }
 0x3cf   :  { %858 = vsyncpa [#allocation5 + $0x1], 1 }
 0x3d0   :  { %859 = vsyncpa [#allocation8], 1 }
 0x3d1   :  { %861 = vsyncpa [#allocation8 + $0x1], 1 }
 0x3d2   :  { %862 = vsyncpa [#allocation6], 1 }
 0x3d3   :  { %864 = vsyncpa [#allocation6 + $0x1], 1 }

</bundles_post_ra>
